<compile_context>
chip_gen: v6e
topology: v6e:2x2x1
jax: 0.10.0
libtpu: 0.0.40
codegen_flags: <defaults>
</compile_context>

<pallas_src>
import functools

import jax
import jax.numpy as jnp
from jax.experimental import pallas as pl
from jax.experimental.pallas import tpu as pltpu


@functools.lru_cache(maxsize=None)
def _device_config():
    """Derive tiling / VMEM budgets from the actual chip (v5e/v6e vs v7x)."""
    try:
        vmem_phys = int(pltpu.get_tpu_info().vmem_capacity_bytes)
    except Exception:  # noqa: BLE001 - fall back to a conservative config
        vmem_phys = 0
    if vmem_phys >= 100 * 1024 * 1024:
        # v5e / v6e class: 128 MiB physical VMEM -> big tiles, high limit.
        return {"tile_f32_bytes": 8 << 20, "row_cap": 4096,
                "vmem_limit": 96 << 20, "bf16_exp": False}
    if vmem_phys > 0:
        # v7x class: 64 MiB VMEM -> re-derived (smaller) budget, bf16 EUP exp.
        return {"tile_f32_bytes": 4 << 20, "row_cap": 2048,
                "vmem_limit": 44 << 20, "bf16_exp": True}
    # Unknown device: conservative budget, f32 exponentials everywhere.
    return {"tile_f32_bytes": 4 << 20, "row_cap": 2048,
            "vmem_limit": 44 << 20, "bf16_exp": False}


def _fa_layer_kernel(t_ref, s_ref, stats_ref, *, hw, exp_dtype):
    """Per-(sample, channel-chunk) statistics.

    t_ref / s_ref : (1, TILE_C, HW) blocks (native wire dtype, f32 compute).
    stats_ref     : (1, 1, 8) f32 output block, written exactly once.
                    Columns: 0 sum t*s | 1 sum t*t | 2 sum s*s
                             3 sum (softmax(t)-softmax(s))^2
                             4 sum (t-s)^2
                             5 sum (mu_t-mu_s)^2 + (var_t-var_s)^2
                             6-7 unused.
    """
    t = t_ref[0].astype(jnp.float32)          # (TILE_C, HW)
    s = s_ref[0].astype(jnp.float32)

    ones_col = jnp.ones((hw, 1), dtype=jnp.float32)

    def rowsum(x):
        # Lane-axis reduction on the MXU (idle otherwise) -> frees XLU/VPU.
        return jnp.dot(x, ones_col, preferred_element_type=jnp.float32)

    inv_hw = jnp.float32(1.0 / hw)

    # ---- moments: centered two-pass variance (== torch var(unbiased=False)).
    mu_t = rowsum(t) * inv_hw                 # (TILE_C, 1)
    mu_s = rowsum(s) * inv_hw
    ct = t - mu_t
    cs = s - mu_s
    row_ctt = rowsum(ct * ct)
    row_css = rowsum(cs * cs)
    var_t = row_ctt * inv_hw
    var_s = row_css * inv_hw

    # Raw second moments for the per-sample cosine.
    row_ts = rowsum(t * s)
    row_tt = row_ctt + jnp.float32(hw) * mu_t * mu_t
    row_ss = row_css + jnp.float32(hw) * mu_s * mu_s

    # Local EMD: unfold(p, p) with H%p==W%p==0 is a pure re-tiling, so the
    # patch MSE equals the plain elementwise MSE over (t - s)^2.
    dts = t - s
    row_le = rowsum(dts * dts)

    # Global EMD: spatial softmax per (n, c); exact normalization (the
    # denominators are only (TILE_C, 1), so an exact divide is ~free).
    t_max = jnp.max(t, axis=1, keepdims=True)     # XLU (kept there)
    s_max = jnp.max(s, axis=1, keepdims=True)
    e_t = jnp.exp((t - t_max).astype(exp_dtype)).astype(jnp.float32)
    e_s = jnp.exp((s - s_max).astype(exp_dtype)).astype(jnp.float32)
    inv_lt = 1.0 / rowsum(e_t)
    inv_ls = 1.0 / rowsum(e_s)
    dp = e_t * inv_lt - e_s * inv_ls
    row_ge = rowsum(dp * dp)

    row_gauss = (mu_t - mu_s) ** 2 + (var_t - var_s) ** 2

    def total(col):                               # (TILE_C, 1) -> (1, 1), tiny
        return jnp.sum(col, axis=0, keepdims=True)

    stats_ref[...] = jnp.concatenate(
        [total(row_ts), total(row_tt), total(row_ss),
         total(row_ge), total(row_le), total(row_gauss),
         jnp.zeros((1, 2), jnp.float32)], axis=1)[None]


def _pick_tile_c(C, HW, itemsize, tile_f32_bytes, row_cap):
    """Largest channel tile that keeps the f32 working set within budget and
    satisfies the TPU sublane constraint (multiple of the dtype's sublane
    packing, or the full C dimension)."""
    sub = 8 * max(1, 4 // itemsize)          # 8 rows for f32, 16 for bf16
    target = max(sub, min(row_cap, tile_f32_bytes // max(1, HW * 4)))
    if C <= target:
        return C
    t = (target // sub) * sub
    for d in range(t, 0, -sub):
        if C % d == 0:
            return d
    return C  # full dim is always legal


def _fa_layer_stats(t_feat, s_feat, patch_size, cfg):
    N, C, H, W = t_feat.shape
    assert s_feat.shape == t_feat.shape
    # Precondition for the "patch MSE == raw MSE" identity used above.
    assert H % patch_size == 0 and W % patch_size == 0
    HW = H * W

    # Free reshapes; dtype preserved on the wire (bf16 stays bf16).
    t3d = t_feat.reshape(N, C, HW)
    s3d = s_feat.reshape(N, C, HW)

    itemsize = jnp.dtype(t3d.dtype).itemsize
    tile_c = _pick_tile_c(C, HW, itemsize, cfg["tile_f32_bytes"],
                          cfg["row_cap"])
    c_chunks = C // tile_c

    exp_dtype = jnp.bfloat16 if cfg["bf16_exp"] else jnp.float32
    kernel = functools.partial(_fa_layer_kernel, hw=HW, exp_dtype=exp_dtype)

    cost = pl.CostEstimate(
        flops=int(34 * N * C * HW),
        transcendentals=int(2 * N * C * HW),
        bytes_accessed=int(2 * N * C * HW * itemsize + N * c_chunks * 8 * 4),
    )

    stats = pl.pallas_call(
        kernel,
        out_shape=jax.ShapeDtypeStruct((N, c_chunks, 8), jnp.float32),
        grid_spec=pltpu.PrefetchScalarGridSpec(
            num_scalar_prefetch=0,
            grid=(N, c_chunks),
            in_specs=[
                pl.BlockSpec((1, tile_c, HW), lambda n, c: (n, c, 0)),
                pl.BlockSpec((1, tile_c, HW), lambda n, c: (n, c, 0)),
            ],
            out_specs=pl.BlockSpec((1, 1, 8), lambda n, c: (n, c, 0)),
        ),
        compiler_params=pltpu.CompilerParams(
            dimension_semantics=("parallel", "parallel"),
            vmem_limit_bytes=cfg["vmem_limit"],
        ),
        cost_estimate=cost,
    )(t3d, s3d)

    stats = jnp.sum(stats, axis=1)               # (N, 8): reduce chunk partials
    ts, tt, ss = stats[:, 0], stats[:, 1], stats[:, 2]
    # torch.cosine_similarity: x.y / max(||x|| * ||y||, eps), eps = 1e-8.
    cos_mean = jnp.mean(ts / jnp.maximum(jnp.sqrt(tt) * jnp.sqrt(ss), 1e-8))
    inv_elems = 1.0 / (N * C * HW)
    global_emd = jnp.sum(stats[:, 3]) * inv_elems
    local_emd = jnp.sum(stats[:, 4]) * inv_elems
    gauss = jnp.sum(stats[:, 5]) / (N * C)
    return cos_mean, global_emd, local_emd, gauss


def fa_forward(teacher_feats, student_feats, patch_size=4, use_local_emd=True,
               feed_bf16=True):
    """JAX/Pallas equivalent of FA.forward(teacher_feats, student_feats)."""
    cfg = _device_config()
    stats = []
    for t, s in zip(teacher_feats, student_feats):
        if feed_bf16:
            # HBM-bound kernel: halve the bytes on the wire (compute stays f32
            # inside the kernel).  In a real pipeline this cast fuses into the
            # feature producer.
            if t.dtype == jnp.float32:
                t = t.astype(jnp.bfloat16)
            if s.dtype == jnp.float32:
                s = s.astype(jnp.bfloat16)
        stats.append(_fa_layer_stats(t, s, patch_size, cfg))

    cos_sims = jnp.stack([st[0] for st in stats])    # (num_layers,)
    attn_w = jax.nn.softmax(cos_sims, axis=0)        # softmax over layers

    total = jnp.float32(0.0)
    for i, (_, g_emd, l_emd, gauss) in enumerate(stats):
        emd = g_emd + l_emd if use_local_emd else g_emd
        total = total + attn_w[i] * (emd + gauss)
    return total


if __name__ == "__main__":
    key = jax.random.PRNGKey(0)
    k1, k2, k3, k4 = jax.random.split(key, 4)

    # Two "layers" of features, NCHW, spatial dims divisible by patch_size=4.
    teacher_feats = [
        jax.random.normal(k1, (2, 4, 16, 16), dtype=jnp.float32),
        jax.random.normal(k2, (2, 8, 8, 8), dtype=jnp.float32),
    ]
    student_feats = [
        jax.random.normal(k3, (2, 4, 16, 16), dtype=jnp.float32),
        jax.random.normal(k4, (2, 8, 8, 8), dtype=jnp.float32),
    ]

    loss = fa_forward(teacher_feats, student_feats, patch_size=4,
                      use_local_emd=True)
    loss = jax.block_until_ready(loss)
    assert loss.shape == () and jnp.isfinite(loss)
    print("KERNEL_OK")
</pallas_src>

<mosaic_0001>
module attributes {stable_mosaic.version = 11 : i64} {
  func.func @_fa_layer_kernel(%arg0: i32, %arg1: i32, %arg2: memref<1x4x256xbf16, #tpu.memory_space<vmem>>, %arg3: memref<1x4x256xbf16, #tpu.memory_space<vmem>>, %arg4: memref<1x1x8xf32, #tpu.memory_space<vmem>>) attributes {dimension_semantics = [#tpu.dimension_semantics<parallel>, #tpu.dimension_semantics<parallel>], iteration_bounds = array<i64: 2, 1>, scalar_prefetch = 0 : i64, scratch_operands = 0 : i64, tpu.core_type = #tpu.core_type<tc>, window_params = [{transform_indices = @transform_0, window_bounds = array<i64: 1, 4, 256>}, {transform_indices = @transform_1, window_bounds = array<i64: 1, 4, 256>}, {transform_indices = @transform_2, window_bounds = array<i64: 1, 1, 8>}]} {
    %c0 = arith.constant 0 : index
    %c0_0 = arith.constant 0 : index
    %c0_1 = arith.constant 0 : index
    %0 = vector.load %arg2[%c0, %c0_0, %c0_1] : memref<1x4x256xbf16, #tpu.memory_space<vmem>>, vector<1x4x256xbf16>
    %1 = vector.shape_cast %0 : vector<1x4x256xbf16> to vector<4x256xbf16>
    %2 = arith.extf %1 : vector<4x256xbf16> to vector<4x256xf32>
    %c0_2 = arith.constant 0 : index
    %c0_3 = arith.constant 0 : index
    %c0_4 = arith.constant 0 : index
    %3 = vector.load %arg3[%c0_2, %c0_3, %c0_4] : memref<1x4x256xbf16, #tpu.memory_space<vmem>>, vector<1x4x256xbf16>
    %4 = vector.shape_cast %3 : vector<1x4x256xbf16> to vector<4x256xbf16>
    %5 = arith.extf %4 : vector<4x256xbf16> to vector<4x256xf32>
    %cst = arith.constant 1.000000e+00 : f32
    %6 = vector.broadcast %cst : f32 to vector<256x1xf32>
    %cst_5 = arith.constant dense<0.000000e+00> : vector<4x1xf32>
    %7 = tpu.matmul %2, %6, %cst_5 {dimension_numbers = #tpu.dot_dimension_numbers<[1], [0], [0], [1], [0, 0, 1, 1], [], []>} : vector<4x256xf32>, vector<256x1xf32>, vector<4x1xf32> -> vector<4x1xf32>
    %cst_6 = arith.constant 3.906250e-03 : f32
    %8 = vector.broadcast %cst_6 : f32 to vector<4x1xf32>
    %9 = arith.mulf %7, %8 : vector<4x1xf32>
    %cst_7 = arith.constant dense<0.000000e+00> : vector<4x1xf32>
    %10 = tpu.matmul %5, %6, %cst_7 {dimension_numbers = #tpu.dot_dimension_numbers<[1], [0], [0], [1], [0, 0, 1, 1], [], []>} : vector<4x256xf32>, vector<256x1xf32>, vector<4x1xf32> -> vector<4x1xf32>
    %cst_8 = arith.constant 3.906250e-03 : f32
    %11 = vector.broadcast %cst_8 : f32 to vector<4x1xf32>
    %12 = arith.mulf %10, %11 : vector<4x1xf32>
    %13 = vector.broadcast %9 : vector<4x1xf32> to vector<4x256xf32>
    %14 = arith.subf %2, %13 : vector<4x256xf32>
    %15 = vector.broadcast %12 : vector<4x1xf32> to vector<4x256xf32>
    %16 = arith.subf %5, %15 : vector<4x256xf32>
    %17 = arith.mulf %14, %14 : vector<4x256xf32>
    %cst_9 = arith.constant dense<0.000000e+00> : vector<4x1xf32>
    %18 = tpu.matmul %17, %6, %cst_9 {dimension_numbers = #tpu.dot_dimension_numbers<[1], [0], [0], [1], [0, 0, 1, 1], [], []>} : vector<4x256xf32>, vector<256x1xf32>, vector<4x1xf32> -> vector<4x1xf32>
    %19 = arith.mulf %16, %16 : vector<4x256xf32>
    %cst_10 = arith.constant dense<0.000000e+00> : vector<4x1xf32>
    %20 = tpu.matmul %19, %6, %cst_10 {dimension_numbers = #tpu.dot_dimension_numbers<[1], [0], [0], [1], [0, 0, 1, 1], [], []>} : vector<4x256xf32>, vector<256x1xf32>, vector<4x1xf32> -> vector<4x1xf32>
    %cst_11 = arith.constant 3.906250e-03 : f32
    %21 = vector.broadcast %cst_11 : f32 to vector<4x1xf32>
    %22 = arith.mulf %18, %21 : vector<4x1xf32>
    %cst_12 = arith.constant 3.906250e-03 : f32
    %23 = vector.broadcast %cst_12 : f32 to vector<4x1xf32>
    %24 = arith.mulf %20, %23 : vector<4x1xf32>
    %25 = arith.mulf %2, %5 : vector<4x256xf32>
    %cst_13 = arith.constant dense<0.000000e+00> : vector<4x1xf32>
    %26 = tpu.matmul %25, %6, %cst_13 {dimension_numbers = #tpu.dot_dimension_numbers<[1], [0], [0], [1], [0, 0, 1, 1], [], []>} : vector<4x256xf32>, vector<256x1xf32>, vector<4x1xf32> -> vector<4x1xf32>
    %cst_14 = arith.constant 2.560000e+02 : f32
    %27 = vector.broadcast %cst_14 : f32 to vector<4x1xf32>
    %28 = arith.mulf %27, %9 : vector<4x1xf32>
    %29 = arith.mulf %28, %9 : vector<4x1xf32>
    %30 = arith.addf %18, %29 : vector<4x1xf32>
    %cst_15 = arith.constant 2.560000e+02 : f32
    %31 = vector.broadcast %cst_15 : f32 to vector<4x1xf32>
    %32 = arith.mulf %31, %12 : vector<4x1xf32>
    %33 = arith.mulf %32, %12 : vector<4x1xf32>
    %34 = arith.addf %20, %33 : vector<4x1xf32>
    %35 = arith.subf %2, %5 : vector<4x256xf32>
    %36 = arith.mulf %35, %35 : vector<4x256xf32>
    %cst_16 = arith.constant dense<0.000000e+00> : vector<4x1xf32>
    %37 = tpu.matmul %36, %6, %cst_16 {dimension_numbers = #tpu.dot_dimension_numbers<[1], [0], [0], [1], [0, 0, 1, 1], [], []>} : vector<4x256xf32>, vector<256x1xf32>, vector<4x1xf32> -> vector<4x1xf32>
    %cst_17 = arith.constant dense<0xFF800000> : vector<4xf32>
    %38 = vector.multi_reduction <maximumf>, %2, %cst_17 [1] : vector<4x256xf32> to vector<4xf32>
    %39 = vector.shape_cast %38 : vector<4xf32> to vector<4x1xf32>
    %cst_18 = arith.constant dense<0xFF800000> : vector<4xf32>
    %40 = vector.multi_reduction <maximumf>, %5, %cst_18 [1] : vector<4x256xf32> to vector<4xf32>
    %41 = vector.shape_cast %40 : vector<4xf32> to vector<4x1xf32>
    %42 = vector.broadcast %39 : vector<4x1xf32> to vector<4x256xf32>
    %43 = arith.subf %2, %42 : vector<4x256xf32>
    %44 = math.exp %43 : vector<4x256xf32>
    %45 = vector.broadcast %41 : vector<4x1xf32> to vector<4x256xf32>
    %46 = arith.subf %5, %45 : vector<4x256xf32>
    %47 = math.exp %46 : vector<4x256xf32>
    %cst_19 = arith.constant dense<0.000000e+00> : vector<4x1xf32>
    %48 = tpu.matmul %44, %6, %cst_19 {dimension_numbers = #tpu.dot_dimension_numbers<[1], [0], [0], [1], [0, 0, 1, 1], [], []>} : vector<4x256xf32>, vector<256x1xf32>, vector<4x1xf32> -> vector<4x1xf32>
    %cst_20 = arith.constant 1.000000e+00 : f32
    %49 = vector.broadcast %cst_20 : f32 to vector<4x1xf32>
    %50 = arith.divf %49, %48 : vector<4x1xf32>
    %cst_21 = arith.constant dense<0.000000e+00> : vector<4x1xf32>
    %51 = tpu.matmul %47, %6, %cst_21 {dimension_numbers = #tpu.dot_dimension_numbers<[1], [0], [0], [1], [0, 0, 1, 1], [], []>} : vector<4x256xf32>, vector<256x1xf32>, vector<4x1xf32> -> vector<4x1xf32>
    %cst_22 = arith.constant 1.000000e+00 : f32
    %52 = vector.broadcast %cst_22 : f32 to vector<4x1xf32>
    %53 = arith.divf %52, %51 : vector<4x1xf32>
    %54 = vector.broadcast %50 : vector<4x1xf32> to vector<4x256xf32>
    %55 = arith.mulf %44, %54 : vector<4x256xf32>
    %56 = vector.broadcast %53 : vector<4x1xf32> to vector<4x256xf32>
    %57 = arith.mulf %47, %56 : vector<4x256xf32>
    %58 = arith.subf %55, %57 : vector<4x256xf32>
    %59 = arith.mulf %58, %58 : vector<4x256xf32>
    %cst_23 = arith.constant dense<0.000000e+00> : vector<4x1xf32>
    %60 = tpu.matmul %59, %6, %cst_23 {dimension_numbers = #tpu.dot_dimension_numbers<[1], [0], [0], [1], [0, 0, 1, 1], [], []>} : vector<4x256xf32>, vector<256x1xf32>, vector<4x1xf32> -> vector<4x1xf32>
    %61 = arith.subf %9, %12 : vector<4x1xf32>
    %62 = arith.mulf %61, %61 : vector<4x1xf32>
    %63 = arith.subf %22, %24 : vector<4x1xf32>
    %64 = arith.mulf %63, %63 : vector<4x1xf32>
    %65 = arith.addf %62, %64 : vector<4x1xf32>
    %cst_24 = arith.constant dense<0.000000e+00> : vector<1xf32>
    %66 = vector.multi_reduction <add>, %26, %cst_24 [0] : vector<4x1xf32> to vector<1xf32>
    %67 = vector.shape_cast %66 : vector<1xf32> to vector<1x1xf32>
    %cst_25 = arith.constant dense<0.000000e+00> : vector<1xf32>
    %68 = vector.multi_reduction <add>, %30, %cst_25 [0] : vector<4x1xf32> to vector<1xf32>
    %69 = vector.shape_cast %68 : vector<1xf32> to vector<1x1xf32>
    %cst_26 = arith.constant dense<0.000000e+00> : vector<1xf32>
    %70 = vector.multi_reduction <add>, %34, %cst_26 [0] : vector<4x1xf32> to vector<1xf32>
    %71 = vector.shape_cast %70 : vector<1xf32> to vector<1x1xf32>
    %cst_27 = arith.constant dense<0.000000e+00> : vector<1xf32>
    %72 = vector.multi_reduction <add>, %60, %cst_27 [0] : vector<4x1xf32> to vector<1xf32>
    %73 = vector.shape_cast %72 : vector<1xf32> to vector<1x1xf32>
    %cst_28 = arith.constant dense<0.000000e+00> : vector<1xf32>
    %74 = vector.multi_reduction <add>, %37, %cst_28 [0] : vector<4x1xf32> to vector<1xf32>
    %75 = vector.shape_cast %74 : vector<1xf32> to vector<1x1xf32>
    %cst_29 = arith.constant dense<0.000000e+00> : vector<1xf32>
    %76 = vector.multi_reduction <add>, %65, %cst_29 [0] : vector<4x1xf32> to vector<1xf32>
    %77 = vector.shape_cast %76 : vector<1xf32> to vector<1x1xf32>
    %cst_30 = arith.constant 0.000000e+00 : f32
    %78 = vector.broadcast %cst_30 : f32 to vector<1x2xf32>
    %79 = tpu.concatenate %67, %69, %71, %73, %75, %77, %78 in 1 : vector<1x1xf32>, vector<1x1xf32>, vector<1x1xf32>, vector<1x1xf32>, vector<1x1xf32>, vector<1x1xf32>, vector<1x2xf32> -> vector<1x8xf32>
    %80 = vector.shape_cast %79 : vector<1x8xf32> to vector<1x1x8xf32>
    %c0_31 = arith.constant 0 : index
    %c0_32 = arith.constant 0 : index
    %c0_33 = arith.constant 0 : index
    %81 = vector.load %arg4[%c0_31, %c0_32, %c0_33] : memref<1x1x8xf32, #tpu.memory_space<vmem>>, vector<1x1x8xf32>
    tpu.vector_store %arg4[%c0_31, %c0_32, %c0_33], %80 {strides = array<i32>} : memref<1x1x8xf32, #tpu.memory_space<vmem>>, vector<1x1x8xf32>,
    return
  }
  func.func @transform_0(%arg0: i32, %arg1: i32) -> (i32, i32, i32) {
    %c0_i32 = arith.constant 0 : i32
    %c0_i32_0 = arith.constant 0 : i32
    return %arg0, %arg1, %c0_i32 : i32, i32, i32
  }
  func.func @transform_1(%arg0: i32, %arg1: i32) -> (i32, i32, i32) {
    %c0_i32 = arith.constant 0 : i32
    %c0_i32_0 = arith.constant 0 : i32
    return %arg0, %arg1, %c0_i32 : i32, i32, i32
  }
  func.func @transform_2(%arg0: i32, %arg1: i32) -> (i32, i32, i32) {
    %c0_i32 = arith.constant 0 : i32
    %c0_i32_0 = arith.constant 0 : i32
    return %arg0, %arg1, %c0_i32 : i32, i32, i32
  }
}

</mosaic_0001>

<bundles_post_ra>
// kernel: tpu_custom_call.1
= control target key start
LH: loop header
LB: loop body
LE: loop exit
PB: predicated region body
PF: predicated region fallthrough
CT: control target
= control target key end

     0   :  { %7 = vsyncpa [#allocation3], 0  ;;  %s2317_s0 = inlined_call_operand.hbm [shape: bf16[2,4,256], index: 0, kind: input, shape index: {}]   ;;  %s2318_s1 = inlined_call_operand.hbm [shape: bf16[2,4,256], index: 1, kind: input, shape index: {}]   ;;  %s2319_s2 = inlined_call_operand.hbm [shape: f32[2,1,8], index: 2, kind: output, shape index: {}]  }
   0x1   :  { %9 = vsyncpa [#allocation3 + $0x1], 0 }
   0x2   :  { %10 = vsyncpa [#allocation6], 0 }
   0x3   :  { %12 = vsyncpa [#allocation6 + $0x1], 0 }
   0x4   :  { %13 = vsyncpa [#allocation4], 0 }
   0x5   :  { %15 = vsyncpa [#allocation4 + $0x1], 0  ;;  %s1774_s9 = smov 0   ;;  %s1776_s10 = smov 0  }
   0x6   :  { %s1778_s11 = smov 0   ;;  %s1780_s12 = smov 0  }
   0x7   :  { %s1782_s13 = smov 0   ;;  %s1784_s14 = smov 0  }
   0x8 LB: > { %s1188_s15 = sadd.s32 4294967295, %s1746_s14   ;;  %s1189_s16 = sadd.s32 4294967294, %s1746_s14   ;;  %s1746_s14 = sphi %s1784_s14, %s21_s14   ;;  %s1742_s13 = sphi %s1782_s13, %s2331_s13   ;;  %s1738_s12 = sphi %s1780_s12, %s2330_s12   ;;  %s1734_s11 = sphi %s1778_s11, %s2329_s11   ;;  %s1730_s10 = sphi %s1776_s10, %s2328_s10   ;;  %s1726_s9 = sphi %s1774_s9, %s2327_s9  }
   0x9   : > { %s33_s17 = sadd.s32 1, %s1742_s13  ;;  %s42_s18 = sadd.s32 1, %s1734_s11 }
   0xa   : > { %p35_p0 = scmp.ge.s32.totalorder %s33_s17, 2  ;;  %p49_p1 = scmp.ne.s32.totalorder %s1734_s11, %s1730_s10 }
   0xb   : > { %p50_p2 = scmp.eq.s32.totalorder %s1746_s14, 0  ;;  %p55_p3 = scmp.ne.s32.totalorder %s1730_s10, %s1726_s9 }
   0xc   : > { %s2333_s17 = smov (%p35_p0, %s33_s17), 0  ;;  %p56_p5 = scmp.eq.s32.totalorder %s1188_s15, 0 }
   0xd   : > { %p1815_p4 = por %p50_p2, %p49_p1  ;;  %s37_s20 = ssub.s32 %s1742_s13, %s2333_s17 }
   0xe   : > { %p109_p6 = scmp.eq.s32.totalorder %s1188_s15, 1  ;;  %p40_p7 = scmp.eq.s32.totalorder %s37_s20, 0 }
   0xf   : > { %p1821_p8 = por %p56_p5, %p55_p3  ;;  %p115_p10 = scmp.eq.s32.totalorder %s1189_s16, 1 }
  0x10   : > { %p1825_p9 = por %p109_p6, %p49_p1  ;;  %p1538_p13 = scmp.lt.s32.totalorder %s1746_s14, 2 }
  0x11   : > { %s1830_s23 = scalar_select %p40_p7, %s1734_s11, %s42_s18  }
  0x12   : > { %p1832_p11 = por %p115_p10, %p55_p3  ;;  %s1839_s25 = sand.u32 1, %s1734_s11  }
  0x13   : > { %s1192_s26 = sshll.u32 %s1839_s25, 2  ;;  %s1204_s27 = sshll.u32 %s1742_s13, 6 }
  0x14   : > { %s147_s30 = scalar_lea.hbm %s2317_s0, %s1204_s27  ;;  %s139_s3 = scalar_lea.vmem [#allocation2], %s1192_s26 }
  0x15   : > { %s149_s4 = sshll.u32 %s139_s3, 4  ;;  %p1848_p0 = pnand %p1538_p13, %p1815_p4  ;;  %s150_s4 = int_to_ptr.vmem [resolvable:$true] %s149_s4 }
  0x16   : > { %p1198_p1 = scmp.ge.s32.totalorder %s1746_s14, 1  ;;  %p175_p2 = scmp.lt.s32.totalorder %s1746_s14, 3 }
  0x17   : > { %s136_s6 = scalar_lea.sflag [#allocation3], %s1839_s25  ;;  %p1608_p3 = pneg %p1848_p0 }
  0x18   : > { %s1619_s7 = scalar_lea.vmem %s150_s4, 64  ;;  %s1748_s8 = smov [#allocation2]  }
  0x19   : > { %p1620_p5 = scmp.ne.s32.totalorder %s150_s4, %s1619_s7  ;;  %s1624_s15 = sshll.u32 %s1748_s8, 4  ;;  %s1625_s15 = int_to_ptr.vmem [resolvable:$false] %s1624_s15 }
  0x1a   : > { %s1626_s16 = scalar_lea.vmem %s1625_s15, 128  ;;  %p1627_p4 = scmp.lt.s32.totalorder %s150_s4, %s1625_s15 }
  0x1b   : > { %p1622_p6 = pnand %p1620_p5, %p1608_p3  ;;  %p1628_p10 = scmp.lt.s32.totalorder %s1626_s16, %s1619_s7 }
  0x1d   : > { %p1623_p7 = pneg %p1622_p6  ;;  %p1629_p13 = por %p1628_p10, %p1627_p4 }
  0x1f   : > { %p1630_p12 = pnand %p1629_p13, %p1623_p7 }
  0x21   : > { %1633 = shalt.err (!%p1630_p12)
}
  0x22   : > { %1530 = dma.hbm_to_vmem [thread:$0]  (!%p1848_p0), %s147_s30, 64, %s150_s4, %s136_s6  }
  0x23   : > { %p1866_p5 = pnand %p1198_p1, %p175_p2  ;;  %s168_s28 = scalar_lea.hbm %s2318_s1, %s1204_s27 }
  0x24   : > { %s160_s29 = scalar_lea.vmem [#allocation5], %s1192_s26  ;;  %s157_s7 = scalar_lea.sflag [#allocation6], %s1839_s25 }
  0x25   : > { %s170_s3 = sshll.u32 %s160_s29, 4  ;;  %s1749_s30 = smov [#allocation5]   ;;  %s171_s3 = int_to_ptr.vmem [resolvable:$true] %s170_s3 }
  0x26   : > { %s1647_s8 = scalar_lea.vmem %s171_s3, 64  ;;  %s1652_s4 = sshll.u32 %s1749_s30, 4  ;;  %s1653_s4 = int_to_ptr.vmem [resolvable:$false] %s1652_s4 }
  0x27   : > { %p1648_p12 = scmp.ne.s32.totalorder %s171_s3, %s1647_s8  ;;  %s1654_s6 = scalar_lea.vmem %s1653_s4, 128 }
  0x28   : > { %p1655_p1 = scmp.lt.s32.totalorder %s171_s3, %s1653_s4  ;;  %p1656_p2 = scmp.lt.s32.totalorder %s1654_s6, %s1647_s8 }
  0x29   : > { %p1650_p6 = pnand %p1648_p12, %p1608_p3 }
  0x2a   : > { %p1657_p4 = por %p1656_p2, %p1655_p1 }
  0x2b   : > { %p1651_p7 = pneg %p1650_p6 }
  0x2d   : > { %p1658_p10 = pnand %p1657_p4, %p1651_p7 }
  0x2f   : > { %1661 = shalt.err (!%p1658_p10)
}
  0x30   : > { %1533 = dma.hbm_to_vmem [thread:$0]  (!%p1848_p0), %s168_s28, 64, %s171_s3, %s157_s7  }
  0x31   : > { %179 = sbr.rel (%p1866_p5) target bundleno = 1184 (0x4a0), region = 28  ;;  %s1882_s25 = sand.u32 (!%p1866_p5), 1, %s1730_s10  }
  0x32   : > { %s1199_s26 = sshll.u32 (!%p1866_p5), %s1882_s25, 2  ;;  %s182_s27 = scalar_lea.sflag (!%p1866_p5), [#allocation3], %s1882_s25 }
  0x33   : > { %s1886_s15 = scalar_lea.vmem (!%p1866_p5), [#allocation2], %s1199_s26 }
  0x36   : > { %1713 = dma.done.wait (%p1821_p8), %s182_s27, 64  }
  0x37   : > { %1715 = vsyncadd (%p1821_p8), %s182_s27, 4294967232  ;;  %s191_s5 = scalar_lea.sflag [#allocation6], %s1882_s25  ;;  %s1893_s16 = scalar_lea.vmem [#allocation5], %s1199_s26 }
  0x38   : > { %1717 = dma.done.wait (%p1821_p8), %s191_s5, 64  }
  0x39   : > { %1719 = vsyncadd (%p1821_p8), %s191_s5, 4294967232  ;;  %v1750_v0 = vmov 1.0   ;;  %v219_v1 = vld [vmem:[%s1886_s15] sm:$0xf]  ;;  %v221_v2 = vld [vmem:[%s1893_s16] sm:$0xf]  ;;  %v378_v25 = vlaneseq }
  0x3a   : > { %1206 = vmatprep.subr.mxu0 %v1750_v0  ;;  %1241 = vmatprep.subr.mxu1 %v1750_v0  ;;  %v1949_v3 = vunpack.c.l.bf16 %v219_v1  ;;  %v1953_v4 = vunpack.c.l.bf16 %v221_v2  ;;  %v1751_v7 = vmov 0   ;;  %vm702_vm0 = vcmask 1043456   ;;  %s1753_s21 = smov 1   ;;  %s1754_s18 = smov 5  }
  0x3b   : > { %1207 = vmatpush3.msra.mxu0 %v1750_v0  ;;  %1242 = vmatpush3.msra.mxu1 %v1750_v0  ;;  %v1752_v23 = vmov 839922192   ;;  %v379_v27 = vshrl.u32 %v378_v25, 7  ;;  %vm993_vm1 = vcmask 3072   ;;  %s1755_s19 = smov 2   ;;  %s1756_s20 = smov 3  }
  0x3c   : > { %1208 = vmatprep.subr.mxu0 %v1750_v0  ;;  %1243 = vmatprep.subr.mxu1 %v1750_v0  ;;  %v1963_v5 = vcombine.high %v1949_v3, %v1949_v3  ;;  %v1969_v6 = vcombine.high %v1953_v4, %v1953_v4  ;;  %v703_v8 = vsel %vm702_vm0, %v1949_v3, -inf  ;;  %v708_v10 = vsel %vm702_vm0, %v1953_v4, -inf  ;;  %s1757_s28 = smov 4   ;;  %s1201_s29 = sshll.u32 %s1738_s12, 4 }
  0x3d   : > { %1209 = vmatpush3.msra.mxu0 %v1750_v0  ;;  %1244 = vmatpush3.msra.mxu1 %v1750_v0  ;;  %v376_v24 = vunpack.c.l.s4 %v1752_v23  ;;  %v2067_v32 = vmul.f32 %v1953_v4, %v1949_v3  ;;  %v627_v41 = vsub.f32 %v1949_v3, %v1953_v4  ;;  %vm1056_vm2 = vcmask 7168   ;;  %s218_s3 = scalar_lea.vmem [#allocation7], %s1882_s25  ;;  %s2275_s4 = scalar_lea.hbm %s2319_s2, %s1201_s29 }
  0x3e   : > { %1210 = vmatprep.subr.mxu0 %v1750_v0  ;;  %1245 = vmatprep.subr.mxu1 %v1750_v0  ;;  %v704_v9 = vsel %vm702_vm0, %v1963_v5, -inf  ;;  %v709_v11 = vsel %vm702_vm0, %v1969_v6, -inf  ;;  %vm1058_vm3 = vcmask 15360   ;;  %vm1060_vm4 = vcmask 23552   ;;  %s1084_s7 = sshll.u32 %s218_s3, 4  ;;  %s1071_s6 = scalar_lea.sflag [#allocation4], %s1882_s25  ;;  %s1085_s7 = int_to_ptr.vmem [resolvable:$true] %s1084_s7 }
  0x3f   : > { %1211 = vmatpush3.msra.mxu0 %v1750_v0  ;;  %1246 = vmatpush3.msra.mxu1 %v1750_v0  ;;  %v705_v12 = vmax.f32 %v703_v8, %v704_v9  ;;  %v710_v13 = vmax.f32 %v708_v10, %v709_v11  ;;  %v377_v26 = vunpack.c.0.s8 %v376_v24  ;;  %v549_v38 = vcombine.high %v2067_v32, %v2067_v32  ;;  %s1662_s12 = scalar_lea.vmem %s1085_s7, 16  ;;  %s1758_s26 = smov [#allocation7]  }
  0x40   : > { %1212 = vmatprep.subr.mxu0 %v1750_v0  ;;  %1247 = vmatprep.subr.mxu1 %v1750_v0  ;;  %v628_v43 = vmul.f32 %v627_v41, %v627_v41  ;;  %vm1062_vm5 = vcmask 31744   ;;  %vm1064_vm6 = vcmask 39936   ;;  %vm1066_vm7 = vcmask 48128   ;;  %p1663_p8 = scmp.ne.s32.totalorder %s1085_s7, %s1662_s12  ;;  %s1666_s27 = sshll.u32 %s1758_s26, 4  ;;  %s1667_s27 = int_to_ptr.vmem [resolvable:$false] %s1666_s27 }
  0x41   : > { %1213 = vmatpush3.msra.mxu0 %v1750_v0  ;;  %1248 = vmatpush3.msra.mxu1 %v1750_v0  ;;  %v2061_v28 = vsub.s32 %v377_v26, %v379_v27  ;;  %vm1068_vm8 = vcmask 57344   ;;  %s1668_s15 = scalar_lea.vmem %s1667_s27, 32  ;;  %p1669_p13 = scmp.lt.s32.totalorder %s1085_s7, %s1667_s27 }
  0x42   : > { %1214 = vmatprep.subr.mxu0 %v1750_v0  ;;  %1249 = vmatprep.subr.mxu1 %v1750_v0  ;;  %v630_v44 = vcombine.high %v628_v43, %v628_v43  ;;  %p1664_p0 = pnand %p1663_p8, %p1825_p9  ;;  %p1670_p5 = scmp.lt.s32.totalorder %s1668_s15, %s1662_s12 }
  0x43   : > { %1215 = vmatpush3.msra.mxu0 %v1750_v0  ;;  %1250 = vmatpush3.msra.mxu1 %v1750_v0 }
  0x44   : > { %1216 = vmatprep.subr.mxu0 %v1750_v0  ;;  %1251 = vmatprep.subr.mxu1 %v1750_v0  ;;  %p1665_p3 = pneg %p1664_p0  ;;  %p1671_p12 = por %p1670_p5, %p1669_p13 }
  0x45   : > { %1217 = vmatpush3.msra.mxu0 %v1750_v0  ;;  %1252 = vmatpush3.msra.mxu1 %v1750_v0 }
  0x46   : > { %1218 = vmatprep.subr.mxu0 %v1750_v0  ;;  %1253 = vmatprep.subr.mxu1 %v1750_v0  ;;  %p1672_p6 = pnand %p1671_p12, %p1665_p3 }
  0x47   : > { %1219 = vmatpush3.msra.mxu0 %v1750_v0  ;;  %1254 = vmatpush3.msra.mxu1 %v1750_v0 }
  0x48   : > { %1220 = vmatprep.subr.mxu0 %v1750_v0  ;;  %1255 = vmatprep.subr.mxu1 %v1750_v0 }
  0x49   : > { %1221 = vmatpush3.msra.mxu0 %v1750_v0  ;;  %1256 = vmatpush3.msra.mxu1 %v1750_v0 }
  0x4a   : > { %1222 = vmatprep.subr.mxu0 %v1750_v0  ;;  %1257 = vmatprep.subr.mxu1 %v1750_v0 }
  0x4b   : > { %1223 = vmatpush3.msra.mxu0 %v1750_v0  ;;  %1258 = vmatpush3.msra.mxu1 %v1750_v0 }
  0x4c   : > { %1224 = vmatprep.subr.mxu0 %v1750_v0  ;;  %1259 = vmatprep.subr.mxu1 %v1750_v0 }
  0x4d   : > { %1225 = vmatpush3.msra.mxu0 %v1750_v0  ;;  %1260 = vmatpush3.msra.mxu1 %v1750_v0 }
  0x4e   : > { %1226 = vmatprep.subr.mxu0 %v1750_v0  ;;  %1261 = vmatprep.subr.mxu1 %v1750_v0 }
  0x4f   : > { %1227 = vmatpush3.msra.mxu0 %v1750_v0  ;;  %1262 = vmatpush3.msra.mxu1 %v1750_v0 }
  0x50   : > { %1228 = vmatprep.subr.mxu0 %v1750_v0  ;;  %1263 = vmatprep.subr.mxu1 %v1750_v0 }
  0x51   : > { %1229 = vmatpush3.msra.mxu0 %v1750_v0  ;;  %1264 = vmatpush3.msra.mxu1 %v1750_v0 }
  0x52   : > { %1230 = vmatprep.subr.mxu0 %v1750_v0  ;;  %1265 = vmatprep.subr.mxu1 %v1750_v0 }
  0x53   : > { %1231 = vmatpush3.msra.mxu0 %v1750_v0  ;;  %1266 = vmatpush3.msra.mxu1 %v1750_v0 }
  0x54   : > { %1232 = vmatprep.subr.mxu0 %v1750_v0  ;;  %1267 = vmatprep.subr.mxu1 %v1750_v0 }
  0x55   : > { %1233 = vmatpush3.msra.mxu0 %v1750_v0  ;;  %1268 = vmatpush3.msra.mxu1 %v1750_v0 }
  0x56   : > { %1234 = vmatprep.subr.mxu0 %v1750_v0  ;;  %1269 = vmatprep.subr.mxu1 %v1750_v0 }
  0x57   : > { %1235 = vmatpush3.msra.mxu0 %v1750_v0  ;;  %1270 = vmatpush3.msra.mxu1 %v1750_v0 }
  0x58   : > { %1236 = vmatprep.subr.mxu0 %v1750_v0  ;;  %1271 = vmatprep.subr.mxu1 %v1750_v0 }
  0x59   : > { %1237 = vmatpush3.msra.mxu0 %v1750_v0  ;;  %290 = vmatprep.mubr.f32.mxu0 %v1963_v5 }
  0x5a   : > { %1272 = vmatpush3.msra.mxu1 %v1750_v0  ;;  %364 = vmatprep.mubr.f32.mxu1 %v1969_v6 }
  0x5b   : > { %291 = vmatmul.mubr.f32.vlgmr.msra.gmra.mxu0 %v1949_v3  ;;  %365 = vmatmul.mubr.f32.vlgmr.msra.gmra.mxu1 %v1953_v4 }
  0x5c   : > { %1276 = vmatprep.subr.mxu0 %v1750_v0  ;;  %1311 = vmatprep.subr.mxu1 %v1750_v0 }
  0x5d   : > { %1277 = vmatpush3.msra.mxu0 %v1750_v0  ;;  %1312 = vmatpush3.msra.mxu1 %v1750_v0 }
  0x5e   : > { %1278 = vmatprep.subr.mxu0 %v1750_v0  ;;  %1313 = vmatprep.subr.mxu1 %v1750_v0 }
  0x5f   : > { %1279 = vmatpush3.msra.mxu0 %v1750_v0  ;;  %1314 = vmatpush3.msra.mxu1 %v1750_v0 }
  0x60   : > { %1280 = vmatprep.subr.mxu0 %v1750_v0  ;;  %1315 = vmatprep.subr.mxu1 %v1750_v0 }
  0x61   : > { %1281 = vmatpush3.msra.mxu0 %v1750_v0  ;;  %1316 = vmatpush3.msra.mxu1 %v1750_v0 }
  0x62   : > { %1282 = vmatprep.subr.mxu0 %v1750_v0  ;;  %1317 = vmatprep.subr.mxu1 %v1750_v0 }
  0x63   : > { %1283 = vmatpush3.msra.mxu0 %v1750_v0  ;;  %1318 = vmatpush3.msra.mxu1 %v1750_v0 }
  0x64   : > { %1284 = vmatprep.subr.mxu0 %v1750_v0  ;;  %1319 = vmatprep.subr.mxu1 %v1750_v0 }
  0x65   : > { %1285 = vmatpush3.msra.mxu0 %v1750_v0  ;;  %1320 = vmatpush3.msra.mxu1 %v1750_v0 }
  0x66   : > { %1286 = vmatprep.subr.mxu0 %v1750_v0  ;;  %1321 = vmatprep.subr.mxu1 %v1750_v0 }
  0x67   : > { %1287 = vmatpush3.msra.mxu0 %v1750_v0  ;;  %1322 = vmatpush3.msra.mxu1 %v1750_v0 }
  0x68   : > { %1288 = vmatprep.subr.mxu0 %v1750_v0  ;;  %1323 = vmatprep.subr.mxu1 %v1750_v0 }
  0x69   : > { %1289 = vmatpush3.msra.mxu0 %v1750_v0  ;;  %1324 = vmatpush3.msra.mxu1 %v1750_v0 }
  0x6a   : > { %1290 = vmatprep.subr.mxu0 %v1750_v0  ;;  %1325 = vmatprep.subr.mxu1 %v1750_v0 }
  0x6b   : > { %1291 = vmatpush3.msra.mxu0 %v1750_v0  ;;  %1326 = vmatpush3.msra.mxu1 %v1750_v0 }
  0x6c   : > { %1292 = vmatprep.subr.mxu0 %v1750_v0  ;;  %1327 = vmatprep.subr.mxu1 %v1750_v0 }
  0x6d   : > { %1293 = vmatpush3.msra.mxu0 %v1750_v0  ;;  %1328 = vmatpush3.msra.mxu1 %v1750_v0 }
  0x6e   : > { %1294 = vmatprep.subr.mxu0 %v1750_v0  ;;  %1329 = vmatprep.subr.mxu1 %v1750_v0 }
  0x6f   : > { %1295 = vmatpush3.msra.mxu0 %v1750_v0  ;;  %1330 = vmatpush3.msra.mxu1 %v1750_v0 }
  0x70   : > { %1296 = vmatprep.subr.mxu0 %v1750_v0  ;;  %1331 = vmatprep.subr.mxu1 %v1750_v0 }
  0x71   : > { %1297 = vmatpush3.msra.mxu0 %v1750_v0  ;;  %1332 = vmatpush3.msra.mxu1 %v1750_v0 }
  0x72   : > { %1298 = vmatprep.subr.mxu0 %v1750_v0  ;;  %1333 = vmatprep.subr.mxu1 %v1750_v0 }
  0x73   : > { %1299 = vmatpush3.msra.mxu0 %v1750_v0  ;;  %1334 = vmatpush3.msra.mxu1 %v1750_v0 }
  0x74   : > { %1300 = vmatprep.subr.mxu0 %v1750_v0  ;;  %1335 = vmatprep.subr.mxu1 %v1750_v0 }
  0x75   : > { %1301 = vmatpush3.msra.mxu0 %v1750_v0  ;;  %1336 = vmatpush3.msra.mxu1 %v1750_v0 }
  0x76   : > { %1302 = vmatprep.subr.mxu0 %v1750_v0  ;;  %1337 = vmatprep.subr.mxu1 %v1750_v0 }
  0x77   : > { %1303 = vmatpush3.msra.mxu0 %v1750_v0  ;;  %1338 = vmatpush3.msra.mxu1 %v1750_v0 }
  0x78   : > { %1304 = vmatprep.subr.mxu0 %v1750_v0  ;;  %1339 = vmatprep.subr.mxu1 %v1750_v0 }
  0x79   : > { %1305 = vmatpush3.msra.mxu0 %v1750_v0  ;;  %1340 = vmatpush3.msra.mxu1 %v1750_v0 }
  0x7a   : > { %1306 = vmatprep.subr.mxu0 %v1750_v0  ;;  %1341 = vmatprep.subr.mxu1 %v1750_v0 }
  0x7b   : > { %1307 = vmatpush3.msra.mxu0 %v1750_v0  ;;  %1342 = vmatpush3.msra.mxu1 %v1750_v0 }
  0x7c   : > { %1346 = vmatprep.subr.mxu0 %v1750_v0  ;;  %1381 = vmatprep.subr.mxu1 %v1750_v0 }
  0x7d   : > { %1596 = vset.pattern.permute.xlu0 %v1751_v7  ;;  %1597 = vset.pattern.permute.xlu1 %v1751_v7 }
  0x7e   : > { %706 = vmax.xlane.f32.xlu1 %v705_v12 }
  0x82   : > { %711 = vmax.xlane.f32.xlu1 %v710_v13 }
 0x107   : > { %v707_v42 = vpop.xlane.xlu1 %706 }
 0x108   : > { %v720_v46 = vrot.slane %v707_v42, %v2061_v28 }
 0x10a   : > { %v722_v48 = vsub.f32 %v1949_v3, %v720_v46 }
 0x10b   : > { %v712_v45 = vpop.xlane.xlu1 %711 }
 0x10c   : > { %v732_v47 = vrot.slane %v712_v45, %v2061_v28  ;;  %v723_v50 = vmul.f32 1.442695, %v722_v48 }
 0x10e   : > { %v734_v49 = vsub.f32 %v1953_v4, %v732_v47  ;;  %1598 = vpow2.f32 %v723_v50 }
 0x110   : > { %v735_v51 = vmul.f32 1.442695, %v734_v49 }
 0x112   : > { %1600 = vpow2.f32 %v735_v51 }
 0x11b   : > { %v1238_v14 = vpop.f32.mrf.mxu0  ;;  %v1273_v15 = vpop.f32.mrf.mxu1 }
 0x11c   : > { %v2187_v52 = vpop.eup %1598 }
 0x11d   : > { %v1239_v16 = vpop.f32.mrf.mxu0  ;;  %v1274_v17 = vpop.f32.mrf.mxu1  ;;  %v738_v54 = vcombine.high %v2187_v52, %v2187_v52 }
 0x11e   : > { %v1240_v18 = vadd.f32 %v1239_v16, %v1238_v14  ;;  %v1275_v19 = vadd.f32 %v1274_v17, %v1273_v15 }
 0x11f   : > { %v2193_v53 = vpop.eup %1600 }
 0x120   : > { %v2051_v20 = vmul.f32 0.00390625, %v1240_v18  ;;  %v2053_v21 = vmul.f32 0.00390625, %v1275_v19  ;;  %v813_v55 = vcombine.high %v2193_v53, %v2193_v53 }
 0x122   : > { %v2057_v22 = vsub.f32 %v2051_v20, %v2053_v21  ;;  %373 = vperm.xlu0 %1596, %v2051_v20   ;;  %v621_v7 = vmul.f32 256.0, %v2051_v20  ;;  %v624_v9 = vmul.f32 256.0, %v2053_v21 }
 0x124   : > { %v625_v12 = vmul.f32 %v624_v9, %v2053_v21  ;;  %v989_v13 = vmul.f32 %v2057_v22, %v2057_v22 }
 0x126   : > { %386 = vperm.xlu0 %1596, %v2053_v21  }
 0x19d   : > { %v374_v29 = vpop.permute.xlu0 %373 }
 0x19e   : > { %v381_v30 = vrot.slane %v374_v29, %v2061_v28 }
 0x1a0   : > { %v383_v31 = vsub.f32 %v1949_v3, %v381_v30 }
 0x1a1   : > { %v387_v33 = vpop.permute.xlu0 %386 }
 0x1a2   : > { %v397_v34 = vmul.f32 %v383_v31, %v383_v31  ;;  %v394_v35 = vrot.slane %v387_v33, %v2061_v28 }
 0x1a4   : > { %v396_v36 = vsub.f32 %v1953_v4, %v394_v35  ;;  %v399_v37 = vcombine.high %v397_v34, %v397_v34 }
 0x1a6   : > { %v471_v39 = vmul.f32 %v396_v36, %v396_v36  ;;  %465 = vmatprep.mubr.f32.mxu0 %v399_v37 }
 0x1a7   : > { %466 = vmatmul.mubr.f32.vlgmr.msra.gmra.mxu0 %v397_v34 }
 0x1a8   : > { %1347 = vmatpush3.msra.mxu0 %v1750_v0  ;;  %v473_v40 = vcombine.high %v471_v39, %v471_v39  ;;  %615 = vmatprep.mubr.f32.mxu0 %v549_v38 }
 0x1a9   : > { %1348 = vmatprep.subr.mxu0 %v1750_v0 }
 0x1aa   : > { %1349 = vmatpush3.msra.mxu0 %v1750_v0  ;;  %539 = vmatprep.mubr.f32.mxu1 %v473_v40 }
 0x1ab   : > { %1350 = vmatprep.subr.mxu0 %v1750_v0  ;;  %540 = vmatmul.mubr.f32.vlgmr.msra.gmra.mxu1 %v471_v39 }
 0x1ac   : > { %1351 = vmatpush3.msra.mxu0 %v1750_v0  ;;  %1382 = vmatpush3.msra.mxu1 %v1750_v0 }
 0x1ad   : > { %1352 = vmatprep.subr.mxu0 %v1750_v0  ;;  %1383 = vmatprep.subr.mxu1 %v1750_v0 }
 0x1ae   : > { %1353 = vmatpush3.msra.mxu0 %v1750_v0  ;;  %1384 = vmatpush3.msra.mxu1 %v1750_v0 }
 0x1af   : > { %1354 = vmatprep.subr.mxu0 %v1750_v0  ;;  %1385 = vmatprep.subr.mxu1 %v1750_v0 }
 0x1b0   : > { %1355 = vmatpush3.msra.mxu0 %v1750_v0  ;;  %1386 = vmatpush3.msra.mxu1 %v1750_v0 }
 0x1b1   : > { %1356 = vmatprep.subr.mxu0 %v1750_v0  ;;  %1387 = vmatprep.subr.mxu1 %v1750_v0 }
 0x1b2   : > { %1357 = vmatpush3.msra.mxu0 %v1750_v0  ;;  %1388 = vmatpush3.msra.mxu1 %v1750_v0 }
 0x1b3   : > { %1358 = vmatprep.subr.mxu0 %v1750_v0  ;;  %1389 = vmatprep.subr.mxu1 %v1750_v0 }
 0x1b4   : > { %1359 = vmatpush3.msra.mxu0 %v1750_v0  ;;  %1390 = vmatpush3.msra.mxu1 %v1750_v0 }
 0x1b5   : > { %1360 = vmatprep.subr.mxu0 %v1750_v0  ;;  %1391 = vmatprep.subr.mxu1 %v1750_v0 }
 0x1b6   : > { %1361 = vmatpush3.msra.mxu0 %v1750_v0  ;;  %1392 = vmatpush3.msra.mxu1 %v1750_v0 }
 0x1b7   : > { %1362 = vmatprep.subr.mxu0 %v1750_v0  ;;  %1393 = vmatprep.subr.mxu1 %v1750_v0 }
 0x1b8   : > { %1363 = vmatpush3.msra.mxu0 %v1750_v0  ;;  %1394 = vmatpush3.msra.mxu1 %v1750_v0 }
 0x1b9   : > { %1364 = vmatprep.subr.mxu0 %v1750_v0  ;;  %1395 = vmatprep.subr.mxu1 %v1750_v0 }
 0x1ba   : > { %1365 = vmatpush3.msra.mxu0 %v1750_v0  ;;  %1396 = vmatpush3.msra.mxu1 %v1750_v0 }
 0x1bb   : > { %1366 = vmatprep.subr.mxu0 %v1750_v0  ;;  %1397 = vmatprep.subr.mxu1 %v1750_v0 }
 0x1bc   : > { %1367 = vmatpush3.msra.mxu0 %v1750_v0  ;;  %1398 = vmatpush3.msra.mxu1 %v1750_v0 }
 0x1bd   : > { %1368 = vmatprep.subr.mxu0 %v1750_v0  ;;  %1399 = vmatprep.subr.mxu1 %v1750_v0 }
 0x1be   : > { %1369 = vmatpush3.msra.mxu0 %v1750_v0  ;;  %1400 = vmatpush3.msra.mxu1 %v1750_v0 }
 0x1bf   : > { %1370 = vmatprep.subr.mxu0 %v1750_v0  ;;  %1401 = vmatprep.subr.mxu1 %v1750_v0 }
 0x1c0   : > { %1371 = vmatpush3.msra.mxu0 %v1750_v0  ;;  %1402 = vmatpush3.msra.mxu1 %v1750_v0 }
 0x1c1   : > { %1372 = vmatprep.subr.mxu0 %v1750_v0  ;;  %1403 = vmatprep.subr.mxu1 %v1750_v0 }
 0x1c2   : > { %1373 = vmatpush3.msra.mxu0 %v1750_v0  ;;  %1404 = vmatpush3.msra.mxu1 %v1750_v0 }
 0x1c3   : > { %1374 = vmatprep.subr.mxu0 %v1750_v0  ;;  %1405 = vmatprep.subr.mxu1 %v1750_v0 }
 0x1c4   : > { %1375 = vmatpush3.msra.mxu0 %v1750_v0  ;;  %1406 = vmatpush3.msra.mxu1 %v1750_v0 }
 0x1c5   : > { %1376 = vmatprep.subr.mxu0 %v1750_v0  ;;  %1407 = vmatprep.subr.mxu1 %v1750_v0 }
 0x1c6   : > { %1377 = vmatpush3.msra.mxu0 %v1750_v0  ;;  %1408 = vmatpush3.msra.mxu1 %v1750_v0 }
 0x1c7   : > { %616 = vmatmul.mubr.f32.vlgmr.msra.gmra.mxu0 %v2067_v32  ;;  %1409 = vmatprep.subr.mxu1 %v1750_v0 }
 0x1c8   : > { %1416 = vmatprep.subr.mxu0 %v1750_v0  ;;  %1410 = vmatpush3.msra.mxu1 %v1750_v0 }
 0x1c9   : > { %1417 = vmatpush3.msra.mxu0 %v1750_v0  ;;  %1411 = vmatprep.subr.mxu1 %v1750_v0 }
 0x1ca   : > { %1418 = vmatprep.subr.mxu0 %v1750_v0  ;;  %1412 = vmatpush3.msra.mxu1 %v1750_v0 }
 0x1cb   : > { %696 = vmatprep.mubr.f32.mxu1 %v630_v44  ;;  %1419 = vmatpush3.msra.mxu0 %v1750_v0 }
 0x1cc   : > { %697 = vmatmul.mubr.f32.vlgmr.msra.gmra.mxu1 %v628_v43  ;;  %1420 = vmatprep.subr.mxu0 %v1750_v0 }
 0x1cd   : > { %1451 = vmatprep.subr.mxu1 %v1750_v0  ;;  %1421 = vmatpush3.msra.mxu0 %v1750_v0 }
 0x1ce   : > { %1452 = vmatpush3.msra.mxu1 %v1750_v0  ;;  %1422 = vmatprep.subr.mxu0 %v1750_v0 }
 0x1cf   : > { %1453 = vmatprep.subr.mxu1 %v1750_v0  ;;  %1423 = vmatpush3.msra.mxu0 %v1750_v0 }
 0x1d0   : > { %1454 = vmatpush3.msra.mxu1 %v1750_v0  ;;  %1424 = vmatprep.subr.mxu0 %v1750_v0 }
 0x1d1   : > { %1455 = vmatprep.subr.mxu1 %v1750_v0  ;;  %1425 = vmatpush3.msra.mxu0 %v1750_v0 }
 0x1d2   : > { %1456 = vmatpush3.msra.mxu1 %v1750_v0  ;;  %1426 = vmatprep.subr.mxu0 %v1750_v0 }
 0x1d3   : > { %1457 = vmatprep.subr.mxu1 %v1750_v0  ;;  %1427 = vmatpush3.msra.mxu0 %v1750_v0 }
 0x1d4   : > { %1458 = vmatpush3.msra.mxu1 %v1750_v0  ;;  %1428 = vmatprep.subr.mxu0 %v1750_v0 }
 0x1d5   : > { %1459 = vmatprep.subr.mxu1 %v1750_v0  ;;  %1429 = vmatpush3.msra.mxu0 %v1750_v0 }
 0x1d6   : > { %1460 = vmatpush3.msra.mxu1 %v1750_v0  ;;  %1430 = vmatprep.subr.mxu0 %v1750_v0 }
 0x1d7   : > { %1461 = vmatprep.subr.mxu1 %v1750_v0  ;;  %1431 = vmatpush3.msra.mxu0 %v1750_v0 }
 0x1d8   : > { %1462 = vmatpush3.msra.mxu1 %v1750_v0  ;;  %1432 = vmatprep.subr.mxu0 %v1750_v0 }
 0x1d9   : > { %1463 = vmatprep.subr.mxu1 %v1750_v0  ;;  %1433 = vmatpush3.msra.mxu0 %v1750_v0 }
 0x1da   : > { %1464 = vmatpush3.msra.mxu1 %v1750_v0  ;;  %1434 = vmatprep.subr.mxu0 %v1750_v0 }
 0x1db   : > { %1465 = vmatprep.subr.mxu1 %v1750_v0  ;;  %1435 = vmatpush3.msra.mxu0 %v1750_v0 }
 0x1dc   : > { %1466 = vmatpush3.msra.mxu1 %v1750_v0  ;;  %1436 = vmatprep.subr.mxu0 %v1750_v0 }
 0x1dd   : > { %1467 = vmatprep.subr.mxu1 %v1750_v0  ;;  %1437 = vmatpush3.msra.mxu0 %v1750_v0 }
 0x1de   : > { %1468 = vmatpush3.msra.mxu1 %v1750_v0  ;;  %1438 = vmatprep.subr.mxu0 %v1750_v0 }
 0x1df   : > { %1469 = vmatprep.subr.mxu1 %v1750_v0  ;;  %1439 = vmatpush3.msra.mxu0 %v1750_v0 }
 0x1e0   : > { %1470 = vmatpush3.msra.mxu1 %v1750_v0  ;;  %1440 = vmatprep.subr.mxu0 %v1750_v0 }
 0x1e1   : > { %1471 = vmatprep.subr.mxu1 %v1750_v0  ;;  %1441 = vmatpush3.msra.mxu0 %v1750_v0 }
 0x1e2   : > { %1472 = vmatpush3.msra.mxu1 %v1750_v0  ;;  %1442 = vmatprep.subr.mxu0 %v1750_v0 }
 0x1e3   : > { %1473 = vmatprep.subr.mxu1 %v1750_v0  ;;  %1443 = vmatpush3.msra.mxu0 %v1750_v0 }
 0x1e4   : > { %1474 = vmatpush3.msra.mxu1 %v1750_v0  ;;  %1444 = vmatprep.subr.mxu0 %v1750_v0 }
 0x1e5   : > { %1475 = vmatprep.subr.mxu1 %v1750_v0  ;;  %1445 = vmatpush3.msra.mxu0 %v1750_v0 }
 0x1e6   : > { %1476 = vmatpush3.msra.mxu1 %v1750_v0  ;;  %1446 = vmatprep.subr.mxu0 %v1750_v0 }
 0x1e7   : > { %1477 = vmatprep.subr.mxu1 %v1750_v0  ;;  %1447 = vmatpush3.msra.mxu0 %v1750_v0 }
 0x1e8   : > { %804 = vmatprep.mubr.f32.mxu0 %v738_v54  ;;  %1478 = vmatpush3.msra.mxu1 %v1750_v0 }
 0x1e9   : > { %805 = vmatmul.mubr.f32.vlgmr.msra.gmra.mxu0 %v2187_v52  ;;  %1479 = vmatprep.subr.mxu1 %v1750_v0 }
 0x1ea   : > { %1480 = vmatpush3.msra.mxu1 %v1750_v0  ;;  %879 = vmatprep.mubr.f32.mxu1 %v813_v55 }
 0x1eb   : > { %1481 = vmatprep.subr.mxu1 %v1750_v0  ;;  %1486 = vmatprep.subr.mxu0 %v1750_v0 }
 0x1ec   : > { %1482 = vmatpush3.msra.mxu1 %v1750_v0  ;;  %1487 = vmatpush3.msra.mxu0 %v1750_v0 }
 0x1ed   : > { %880 = vmatmul.mubr.f32.vlgmr.msra.gmra.mxu1 %v2193_v53  ;;  %1488 = vmatprep.subr.mxu0 %v1750_v0 }
 0x1ee   : > { %1489 = vmatpush3.msra.mxu0 %v1750_v0 }
 0x1ef   : > { %1490 = vmatprep.subr.mxu0 %v1750_v0 }
 0x1f0   : > { %1491 = vmatpush3.msra.mxu0 %v1750_v0 }
 0x1f1   : > { %1492 = vmatprep.subr.mxu0 %v1750_v0 }
 0x1f2   : > { %1493 = vmatpush3.msra.mxu0 %v1750_v0 }
 0x1f3   : > { %1494 = vmatprep.subr.mxu0 %v1750_v0 }
 0x1f4   : > { %1495 = vmatpush3.msra.mxu0 %v1750_v0 }
 0x1f5   : > { %1496 = vmatprep.subr.mxu0 %v1750_v0 }
 0x1f6   : > { %1497 = vmatpush3.msra.mxu0 %v1750_v0 }
 0x1f7   : > { %1498 = vmatprep.subr.mxu0 %v1750_v0 }
 0x1f8   : > { %1499 = vmatpush3.msra.mxu0 %v1750_v0 }
 0x1f9   : > { %1500 = vmatprep.subr.mxu0 %v1750_v0 }
 0x1fa   : > { %1501 = vmatpush3.msra.mxu0 %v1750_v0 }
 0x1fb   : > { %1502 = vmatprep.subr.mxu0 %v1750_v0 }
 0x1fc   : > { %1503 = vmatpush3.msra.mxu0 %v1750_v0 }
 0x1fd   : > { %1504 = vmatprep.subr.mxu0 %v1750_v0 }
 0x1fe   : > { %1505 = vmatpush3.msra.mxu0 %v1750_v0 }
 0x1ff   : > { %1506 = vmatprep.subr.mxu0 %v1750_v0 }
 0x200   : > { %1507 = vmatpush3.msra.mxu0 %v1750_v0 }
 0x201   : > { %1508 = vmatprep.subr.mxu0 %v1750_v0 }
 0x202   : > { %1509 = vmatpush3.msra.mxu0 %v1750_v0 }
 0x203   : > { %1510 = vmatprep.subr.mxu0 %v1750_v0 }
 0x204   : > { %1511 = vmatpush3.msra.mxu0 %v1750_v0 }
 0x205   : > { %1512 = vmatprep.subr.mxu0 %v1750_v0 }
 0x206   : > { %1513 = vmatpush3.msra.mxu0 %v1750_v0 }
 0x207   : > { %1514 = vmatprep.subr.mxu0 %v1750_v0 }
 0x208   : > { %1515 = vmatpush3.msra.mxu0 %v1750_v0 }
 0x209   : > { %1516 = vmatprep.subr.mxu0 %v1750_v0 }
 0x20a   : > { %1517 = vmatpush3.msra.mxu0 %v1750_v0  ;;  %v622_v0 = vmul.f32 %v621_v7, %v2051_v20 }
 0x267   : > { %v1308_v56 = vpop.f32.mrf.mxu0 }
 0x269   : > { %v1309_v57 = vpop.f32.mrf.mxu0 }
 0x26a   : > { %v1310_v4 = vadd.f32 %v1309_v57, %v1308_v56 }
 0x26b   : > { %v1343_v58 = vpop.f32.mrf.mxu1 }
 0x26c   : > { %v545_v6 = vmul.f32 0.00390625, %v1310_v4  ;;  %v623_v10 = vadd.f32 %v1310_v4, %v622_v0 }
 0x26d   : > { %v1344_v61 = vpop.f32.mrf.mxu1 }
 0x26e   : > { %v1345_v3 = vadd.f32 %v1344_v61, %v1343_v58  ;;  %v1001_v14 = vsel %vm993_vm1, %v623_v10, 0.0 }
 0x26f   : > { %v1002_v18 = vrot.slane %v1001_v14, 4 }
 0x270   : > { %v546_v5 = vmul.f32 0.00390625, %v1345_v3  ;;  %v626_v15 = vadd.f32 %v1345_v3, %v625_v12 }
 0x271   : > { %v1003_v26 = vadd.f32 %v1002_v18, %v1001_v14 }
 0x272   : > { %v990_v8 = vsub.f32 %v545_v6, %v546_v5  ;;  %v1008_v19 = vsel %vm993_vm1, %v626_v15, 0.0 }
 0x273   : > { %v1009_v27 = vrot.slane %v1008_v19, 4  ;;  %v1004_v22 = vrot.slane %v1003_v26, 2 }
 0x274   : > { %v991_v11 = vmul.f32 %v990_v8, %v990_v8 }
 0x275   : > { %v1010_v31 = vadd.f32 %v1009_v27, %v1008_v19  ;;  %v1005_v34 = vadd.f32 %v1004_v22, %v1003_v26 }
 0x276   : > { %v992_v16 = vadd.f32 %v991_v11, %v989_v13 }
 0x277   : > { %v1011_v33 = vrot.slane %v1010_v31, 2  ;;  %v1006_v36 = vrot.slane %v1005_v34, 1 }
 0x278   : > { %v1029_v20 = vsel %vm993_vm1, %v992_v16, 0.0 }
 0x279   : > { %v1030_v21 = vrot.slane %v1029_v20, 4  ;;  %v1012_v38 = vadd.f32 %v1011_v33, %v1010_v31  ;;  %v1007_v40 = vadd.f32 %v1006_v36, %v1005_v34 }
 0x27b   : > { %v1031_v32 = vadd.f32 %v1030_v21, %v1029_v20  ;;  %v1013_v42 = vrot.slane %v1012_v38, 1 }
 0x27d   : > { %v1032_v35 = vrot.slane %v1031_v32, 2  ;;  %v1014_v45 = vadd.f32 %v1013_v42, %v1012_v38 }
 0x27f   : > { %v1033_v37 = vadd.f32 %v1032_v35, %v1031_v32 }
 0x281   : > { %v1034_v41 = vrot.slane %v1033_v37, 1 }
 0x283   : > { %v1035_v44 = vadd.f32 %v1034_v41, %v1033_v37 }
 0x287   : > { %v1378_v59 = vpop.f32.mrf.mxu0 }
 0x289   : > { %v1379_v60 = vpop.f32.mrf.mxu0 }
 0x28a   : > { %v2248_v62 = vadd.f32 %v1379_v60, %v1378_v59 }
 0x28c   : > { %v1413_v63 = vpop.f32.mrf.mxu1 }
 0x28e   : > { %v1414_v1 = vpop.f32.mrf.mxu1 }
 0x28f   : > { %v2250_v2 = vadd.f32 %v1414_v1, %v1413_v63 }
 0x291   : > { %v1022_v57 = vsel %vm993_vm1, %v2250_v2, 0.0  ;;  %v994_v2 = vsel %vm993_vm1, %v2248_v62, 0.0 }
 0x292   : > { %v1023_v58 = vrot.slane %v1022_v57, 4  ;;  %v995_v9 = vrot.slane %v994_v2, 4 }
 0x294   : > { %v1024_v63 = vadd.f32 %v1023_v58, %v1022_v57  ;;  %v996_v10 = vadd.f32 %v995_v9, %v994_v2 }
 0x296   : > { %v1025_v3 = vrot.slane %v1024_v63, 2  ;;  %v997_v11 = vrot.slane %v996_v10, 2 }
 0x298   : > { %v998_v13 = vadd.f32 %v997_v11, %v996_v10 }
 0x29a   : > { %v999_v14 = vrot.slane %v998_v13, 1 }
 0x29c   : > { %v1000_v16 = vadd.f32 %v999_v14, %v998_v13 }
 0x2a9   : > { %v1448_v17 = vpop.f32.mrf.mxu0 }
 0x2ab   : > { %v1449_v23 = vpop.f32.mrf.mxu0 }
 0x2ac   : > { %v1450_v24 = vadd.f32 %v1449_v23, %v1448_v17 }
 0x2ad   : > { %v1483_v25 = vpop.f32.mrf.mxu1 }
 0x2ae   : > { %1602 = vrcp.f32 %v1450_v24 }
 0x2af   : > { %v1484_v29 = vpop.f32.mrf.mxu1 }
 0x2b0   : > { %v1485_v30 = vadd.f32 %v1484_v29, %v1483_v25 }
 0x2b2   : > { %1604 = vrcp.f32 %v1485_v30 }
 0x2bb   : > { %v1603_v39 = vpop.eup %1602 }
 0x2bc   : > { %889 = vperm.xlu0 %1596, %v1603_v39  }
 0x2bf   : > { %v1605_v43 = vpop.eup %1604 }
 0x2c0   : > { %902 = vperm.xlu1 %1597, %v1605_v43   ;;  %1037 = vrot.lane.b32.xlu0 %v1007_v40, %s1753_s21 }
 0x2c4   : > { %1053 = vrot.lane.b32.xlu1 %v1035_v44, %s1754_s18  ;;  %1041 = vrot.lane.b32.xlu0 %v1014_v45, %s1755_s19 }
 0x337   : > { %v890_v46 = vpop.permute.xlu0 %889 }
 0x338   : > { %v897_v47 = vrot.slane %v890_v46, %v2061_v28 }
 0x33a   : > { %v899_v50 = vmul.f32 %v2187_v52, %v897_v47 }
 0x33b   : > { %v903_v48 = vpop.permute.xlu1 %902  ;;  %v1038_v12 = vpop.permute.xlu0 %1037 }
 0x33c   : > { %v910_v49 = vrot.slane %v903_v48, %v2061_v28  ;;  %v1057_v18 = vsel %vm1056_vm2, %v1000_v16, %v1038_v12 }
 0x33e   : > { %v912_v51 = vmul.f32 %v2193_v53, %v910_v49  ;;  %v1026_v53 = vadd.f32 %v1025_v3, %v1024_v63 }
 0x33f   : > { %v1042_v15 = vpop.permute.xlu0 %1041  ;;  %v1054_v20 = vpop.permute.xlu1 %1053 }
 0x340   : > { %v913_v54 = vsub.f32 %v899_v50, %v912_v51  ;;  %v1027_v8 = vrot.slane %v1026_v53, 1  ;;  %v1059_v19 = vsel %vm1058_vm3, %v1057_v18, %v1042_v15 }
 0x342   : > { %v914_v55 = vmul.f32 %v913_v54, %v913_v54  ;;  %v1028_v0 = vadd.f32 %v1027_v8, %v1026_v53 }
 0x344   : > { %v916_v56 = vcombine.high %v914_v55, %v914_v55 }
 0x346   : > { %982 = vmatprep.mubr.f32.mxu0 %v916_v56 }
 0x347   : > { %983 = vmatmul.mubr.f32.vlgmr.msra.gmra.mxu0 %v914_v55 }
 0x407   : > { %v1518_v59 = vpop.f32.mrf.mxu0 }
 0x409   : > { %v1519_v60 = vpop.f32.mrf.mxu0 }
 0x40a   : > { %v1520_v61 = vadd.f32 %v1519_v60, %v1518_v59 }
 0x40c   : > { %v1015_v1 = vsel %vm993_vm1, %v1520_v61, 0.0 }
 0x40d   : > { %v1016_v28 = vrot.slane %v1015_v1, 4 }
 0x40f   : > { %v1017_v52 = vadd.f32 %v1016_v28, %v1015_v1 }
 0x411   : > { %v1018_v4 = vrot.slane %v1017_v52, 2 }
 0x413   : > { %v1019_v5 = vadd.f32 %v1018_v4, %v1017_v52 }
 0x415   : > { %v1020_v6 = vrot.slane %v1019_v5, 1 }
 0x417   : > { %v1021_v7 = vadd.f32 %v1020_v6, %v1019_v5 }
 0x419   : > { %1045 = vrot.lane.b32.xlu0 %v1021_v7, %s1756_s20 }
 0x41d   : > { %1049 = vrot.lane.b32.xlu0 %v1028_v0, %s1757_s28 }
 0x48b   : > { %v1046_v17 = vpop.permute.xlu0 %1045 }
 0x48c   : > { %v1061_v62 = vsel %vm1060_vm4, %v1059_v19, %v1046_v17 }
 0x48f   : > { %v1050_v23 = vpop.permute.xlu0 %1049 }
 0x490   : > { %v1063_v24 = vsel %vm1062_vm5, %v1061_v62, %v1050_v23 }
 0x491   : > { %v1065_v25 = vsel %vm1064_vm6, %v1063_v24, %v1054_v20 }
 0x492   : > { %v1067_v26 = vsel %vm1066_vm7, %v1065_v25, 0.0 }
 0x493   : > { %1069 = vst.msk [vmem:[%s218_s3] sm:$0x1] %vm1068_vm8, %v1067_v26 }
 0x494   : > { %1675 = shalt.err (!%p1672_p6)
}
 0x495   : > { %s1676_s5 = scalar_lea.hbm %s2275_s4, 16  ;;  %s1680_s21 = scalar_lea.hbm %s2319_s2, 32 }
 0x496   : > { %p1677_p7 = scmp.ne.s32.totalorder %s2275_s4, %s1676_s5  ;;  %p1681_p4 = scmp.lt.s32.totalorder %s2275_s4, %s2319_s2 }
 0x497   : > { %p1682_p10 = scmp.lt.s32.totalorder %s1680_s21, %s1676_s5 }
 0x498   : > { %p1678_p1 = pnand %p1677_p7, %p1825_p9 }
 0x499   : > { %p1683_p8 = por %p1682_p10, %p1681_p4 }
 0x49a   : > { %p1679_p2 = pneg %p1678_p1 }
 0x49c   : > { %p1684_p0 = pnand %p1683_p8, %p1679_p2 }
 0x49e   : > { %1687 = shalt.err (!%p1684_p0)
}
 0x49f   : > { %1525 = dma.vmem_to_hbm [thread:$0]  (%p1825_p9), %s1085_s7, 16, %s2275_s4, %s1071_s6  }
 0x4a0 PF: > { %s1096_s20 = sand.u32 1, %s1726_s9   ;;  %p2326_p3 = scmp.ge.s32.totalorder %s1746_s14, 2 }
 0x4a1   : > { %s1097_s28 = scalar_lea.sflag [#allocation4], %s1096_s20 }
 0x4a2   : > { %p1535_p13 = pnand %p2326_p3, %p1832_p11 }
 0x4a4   : > { %p1536_p5 = pneg %p1535_p13 }
 0x4a6   : > { %1721 = dma.done.wait (%p1536_p5), %s1097_s28, 16  }
 0x4a7   : > { %1723 = vsyncadd (%p1536_p5), %s1097_s28, 4294967280  ;;  %s21_s14 = sadd.s32 1, %s1746_s14   ;;  %s2327_s9 = smov %s1730_s10 }
 0x4a8   : > { %p18_p12 = scmp.ge.s32.totalorder %s21_s14, 4   ;;  %s2328_s10 = smov %s1734_s11 }
 0x4a9   : > { %s2329_s11 = smov %s1830_s23  ;;  %s2330_s12 = smov %s1742_s13 }
 0x4aa   : > { %s2331_s13 = smov %s2333_s17  ;;  %20 = sbr.rel (!%p18_p12) target bundleno = 8 (0x8), region = 86 }
 0x4af   :  { %1101 = vsyncpa [#allocation3], 1 }
 0x4b0   :  { %1103 = vsyncpa [#allocation3 + $0x1], 1 }
 0x4b1   :  { %1104 = vsyncpa [#allocation6], 1 }
 0x4b2   :  { %1106 = vsyncpa [#allocation6 + $0x1], 1 }
 0x4b3   :  { %1107 = vsyncpa [#allocation4], 1 }
 0x4b4   :  { %1109 = vsyncpa [#allocation4 + $0x1], 1 }

</bundles_post_ra>
